<compile_context>
chip_gen: v6e
topology: v6e:2x2x1
jax: 0.10.0
libtpu: 0.0.40
codegen_flags: <defaults>
</compile_context>

<pallas_src>
import jax
import jax.numpy as jnp
from jax import lax
from jax.experimental import pallas as pl
from jax.experimental.pallas import tpu as pltpu
import numpy as np

# ----------------------------- "config" of the module ------------------------------------
BATCH = 2        # test batch
C = 8            # config['C']   (EEG channels)
T = 32           # config['T']   (time samples)
F1 = 4           # config['filter_1']
D = 2            # config['D']
F1D = F1 * D
F2 = 8           # config['filter_2']
K1 = 7           # c_kernel_1 = (1, 7), padding 'same'
K3 = 3           # c_kernel_3 = (1, 3), padding 'same'
POOL1 = 2        # p_kernel_1 = (1, 2)
POOL2 = 2        # p_kernel_2 = (1, 2)
NCLS = 3         # config['n_classes']
T1 = T // POOL1  # time length after first AvgPool
W = T1 // POOL2  # time length after second AvgPool
EPS = 1e-5       # BatchNorm eps

L1, R1 = (K1 - 1) // 2, (K1 - 1) - (K1 - 1) // 2   # PyTorch 'same' padding split
L3, R3 = (K3 - 1) // 2, (K3 - 1) - (K3 - 1) // 2

BLK_B = 2                   # samples per grid step
NR = BLK_B * F1D            # 16 rows of every per-(sample, channel) block
LANES = 128                 # slab lane width

# ----------------------------- packed parameter-slab layout -------------------------------
ROW_TOEP = 0                     # (32, 128) Toeplitz bank of the temporal conv (all F1 filters)
ROW_Q = ROW_TOEP + T             # (32, 128) AvgPool(1,2) fused with the K3 shifted taps (lanes<48)
ROW_MASK = ROW_Q + T             # (16, 128) group-selection mask, pre-expanded per 32-lane block
ROW_W3 = ROW_MASK + NR           # (16, 128) depthwise (1,K3) taps, pre-expanded per 16-lane block
ROW_WFC = ROW_W3 + NR            # (16, 128) FC weight (pool2 folded), one 16-lane block per class
ROW_P1 = ROW_WFC + NR            # (16, 128) block-diag spatial weight (BN1*BN2 folded) + cb2
ROW_P2 = ROW_P1 + NR             # (16, 128) block-diag pointwise weight (BN3 folded) + b3
ROW_CSEL = ROW_P2 + NR           # (48, 128) per-class block-one-hot lane reducer
ROW_TAIL = ROW_CSEL + NCLS * T1  # (8, 128)  classifier batch-sum selector + bias
SLAB_ROWS = ROW_TAIL + 8         # 200

assert F1 * T == LANES
assert NCLS * T1 <= LANES
assert NR == BLK_B * C == BLK_B * F2 == 16
assert SLAB_ROWS % 8 == 0

# advisory cost estimate (per batch block)
_FLOPS_BLK = 2 * (NR * (BLK_B * C) * T        # w2s @ x
                  + NR * T * LANES            # s @ toep
                  + NR * T * LANES            # e2 @ q
                  + NR * NR * LANES           # a3 @ h3rep
                  + BLK_B * NR * LANES        # selb @ mcl
                  + BLK_B * (NCLS * T1) * NCLS)
_TRANS_BLK = NR * T + NR * LANES + BLK_B * (NCLS + 1)
_BYTES_BLK = 4 * (BLK_B * C * T + 8 * LANES)
_BYTES_SLAB = 4 * SLAB_ROWS * LANES


def _elu(x):
    # ELU(alpha=1), overflow-safe false branch
    return jnp.where(x > 0, x, jnp.exp(jnp.minimum(x, 0.0)) - 1.0)


# ----------------------------------- Pallas kernel ----------------------------------------
def eegnet_kernel(x_ref, p_ref, o_ref):
    HI = lax.Precision.HIGHEST
    f32 = jnp.float32

    x = x_ref[...]                                                       # (16, 32) rows = (b, c)

    toep = p_ref[ROW_TOEP:ROW_TOEP + T, :]                               # (32, 128)
    q128 = p_ref[ROW_Q:ROW_Q + T, :]                                     # (32, 128)
    maskx = p_ref[ROW_MASK:ROW_MASK + NR, :]                             # (16, 128)
    w3x = p_ref[ROW_W3:ROW_W3 + NR, :]                                   # (16, 128)
    wfcx = p_ref[ROW_WFC:ROW_WFC + NR, :]                                # (16, 128)
    p1 = p_ref[ROW_P1:ROW_P1 + NR, :]                                    # (16, 128)
    p2 = p_ref[ROW_P2:ROW_P2 + NR, :]                                    # (16, 128)
    cselb = p_ref[ROW_CSEL:ROW_CSEL + NCLS * T1, :]                      # (48, 128)
    tail = p_ref[ROW_TAIL:ROW_TAIL + 8, :]                               # (8, 128)

    w2s = p1[:, 0:BLK_B * C]                                             # (16, 16) block-diag
    cb2 = p1[:, BLK_B * C:BLK_B * C + 1]                                 # (16, 1)
    a3 = p2[:, 0:NR]                                                     # (16, 16) block-diag
    b3 = p2[:, NR:NR + 1]                                                # (16, 1)
    csel = cselb[:, 0:NCLS]                                              # (48, 3)
    selb = tail[0:BLK_B, 0:NR]                                           # (2, 16)
    bfc = tail[BLK_B:BLK_B + 1, 0:NCLS]                                  # (1, 3)

    # --- Block 1: spatial depthwise conv (BN1/BN2 scales folded) then the 'same' temporal conv
    # for all F1 filters at once via the Toeplitz bank (two MXU ops).
    s = jnp.dot(w2s, x, precision=HI, preferred_element_type=f32)        # (16, 32) rows = (b, o)
    hall = jnp.dot(s, toep, precision=HI, preferred_element_type=f32)    # (16, 128) 4 filter blocks
    # group selection: pre-expanded mask multiply (VPU) + XLU roll block-sum (no lane slices)
    hsel = hall * maskx
    acc1 = hsel + pltpu.roll(hsel, shift=2 * T, axis=1)
    acc1 = acc1 + pltpu.roll(acc1, shift=3 * T, axis=1)
    h2 = acc1[:, 0:T] + cb2                                              # (16, 32) + folded BN bias
    e2 = _elu(h2)                                                        # activation; dropout = id

    # --- Block 2: AvgPool(1,2) fused with the K3 shifted taps in ONE matmul, taps applied with a
    # pre-expanded multiplier, then a full cyclic XLU block-sum (result replicated in every block).
    pmat = jnp.dot(e2, q128, precision=HI, preferred_element_type=f32)   # (16, 128) lanes>=48 zero
    pw = pmat * w3x
    acc2 = pw + pltpu.roll(pw, shift=T1, axis=1)
    acc2 = acc2 + pltpu.roll(acc2, shift=2 * T1, axis=1)
    h3rep = acc2 + pltpu.roll(acc2, shift=4 * T1, axis=1)                # every 16-lane block = h3
    # pointwise 1x1 conv + BN3 (scale folded into a3, shift added) + ELU, carried at lane width 128
    h4 = jnp.dot(a3, h3rep, precision=HI, preferred_element_type=f32) + b3
    e4 = _elu(h4)                                                        # every 16-lane block = e4

    # --- Classifier: AvgPool(1,2) + flatten + Linear folded into per-class 16-lane weight blocks;
    # reductions done on the MXU (no concatenate, no cross-lane jnp.sum).
    mcl = e4 * wfcx                                                      # (16, 128) lanes>=48 zero
    rowred = jnp.dot(selb, mcl, precision=HI, preferred_element_type=f32)        # (2, 128)
    logits = jnp.dot(rowred[:, 0:NCLS * T1], csel,
                     precision=HI, preferred_element_type=f32) + bfc             # (2, 3)

    # LogSoftmax(dim=1); lane-dense (8, 128) store, result in [0:BLK_B, 0:NCLS]
    m = jnp.max(logits, axis=1, keepdims=True)
    lse = m + jnp.log(jnp.sum(jnp.exp(logits - m), axis=1, keepdims=True))
    o_ref[...] = jnp.zeros_like(o_ref)
    o_ref[0:BLK_B, 0:NCLS] = logits - lse


def eegnet_classifier_forward(x_nchw, slab):
    bt = x_nchw.shape[0]
    assert bt % BLK_B == 0, "batch must be a multiple of BLK_B"
    nb = bt // BLK_B
    if x_nchw.dtype != jnp.float32:
        x_nchw = x_nchw.astype(jnp.float32)
    x2d = x_nchw.reshape(bt * C, T)          # free contiguous reshape of NCHW (depth plane == 1)
    out = pl.pallas_call(
        eegnet_kernel,
        out_shape=jax.ShapeDtypeStruct((nb * 8, LANES), jnp.float32),
        grid=(nb,),
        in_specs=[
            pl.BlockSpec((BLK_B * C, T), lambda i: (i, 0)),
            pl.BlockSpec((SLAB_ROWS, LANES), lambda i: (0, 0)),   # slab resident across blocks
        ],
        out_specs=pl.BlockSpec((8, LANES), lambda i: (i, 0)),
        compiler_params=pltpu.CompilerParams(dimension_semantics=("parallel",)),
        cost_estimate=pl.CostEstimate(
            flops=nb * _FLOPS_BLK,
            transcendentals=nb * _TRANS_BLK,
            bytes_accessed=nb * _BYTES_BLK + _BYTES_SLAB),
    )(x2d, slab)
    return out.reshape(nb, 8, LANES)[:, 0:BLK_B, 0:NCLS].reshape(bt, NCLS)


# ----------------------- fold & pack module parameters into one slab -----------------------
def pack_params(p):
    grp = np.arange(F1D) // D                          # group of each depthwise output channel

    # Toeplitz bank for the 'same' temporal conv: block f implements conv with w1[f]
    tpr = np.arange(T)[:, None]                        # t' (input time, rows)
    tt = np.arange(T)[None, :]                         # t  (output time, cols)
    kk = tpr - tt + L1
    valid = (kk >= 0) & (kk < K1)
    kkc = np.clip(kk, 0, K1 - 1)
    w1 = np.asarray(p["w1"], np.float32)
    toep = np.zeros((T, LANES), np.float32)
    for f in range(F1):
        toep[:, f * T:(f + 1) * T] = np.where(valid, w1[f][kkc], 0.0)

    # Q_k = AvgPool(1,2) followed by a shift of (k - L3) with zero padding; lane-padded to 128
    pool1 = np.zeros((T, T1), np.float32)
    pool1[np.arange(T), np.arange(T) // POOL1] = 1.0 / POOL1
    q = np.zeros((T, LANES), np.float32)
    for k in range(K3):
        shift = np.zeros((T1, T1), np.float32)
        for u in range(T1):
            up = u + k - L3
            if 0 <= up < T1:
                shift[up, u] = 1.0
        q[:, k * T1:(k + 1) * T1] = pool1 @ shift

    # pre-expanded group-selection mask (rows = (b, o), 4 filter blocks of 32 lanes)
    maskx = np.zeros((NR, LANES), np.float32)
    for r in range(NR):
        f = grp[r % F1D]
        maskx[r, f * T:(f + 1) * T] = 1.0

    # pre-expanded depthwise (1, K3) taps (rows = (b, o), 3 tap blocks of 16 lanes)
    w3 = np.asarray(p["w3"], np.float32)
    w3x = np.zeros((NR, LANES), np.float32)
    for r in range(NR):
        for k in range(K3):
            w3x[r, k * T1:(k + 1) * T1] = w3[r % F1D, k]

    # FC weight with pool2 folded (rows = (b, f2), one 16-lane block per class)
    wfc = np.asarray(p["wfc"], np.float32).reshape(NCLS, F2, W)
    rep = np.repeat(np.arange(W), POOL2)
    wfcx = np.zeros((NR, LANES), np.float32)
    for r in range(NR):
        for n in range(NCLS):
            wfcx[r, n * T1:(n + 1) * T1] = (1.0 / POOL2) * wfc[n, r % F2, rep]

    # P1: block-diag spatial depthwise weight with BN1*BN2 scales folded + folded bias cb2
    w2 = np.asarray(p["w2"], np.float32)
    bn1s, bn1b = np.asarray(p["bn1_scale"]), np.asarray(p["bn1_shift"])
    bn2s, bn2b = np.asarray(p["bn2_scale"]), np.asarray(p["bn2_shift"])
    w2s = w2 * (bn2s * bn1s[grp])[:, None]
    cb2 = bn2s * bn1b[grp] * w2.sum(axis=1) + bn2b
    p1 = np.zeros((NR, LANES), np.float32)
    p1[:, 0:BLK_B * C] = np.kron(np.eye(BLK_B, dtype=np.float32), w2s)
    p1[:, BLK_B * C] = np.tile(cb2, BLK_B)

    # P2: block-diag pointwise conv weight with BN3 scale folded + BN3 shift
    wp = np.asarray(p["wp"], np.float32)
    bn3s, bn3b = np.asarray(p["bn3_scale"]), np.asarray(p["bn3_shift"])
    p2 = np.zeros((NR, LANES), np.float32)
    p2[:, 0:NR] = np.kron(np.eye(BLK_B, dtype=np.float32), bn3s[:, None] * wp)
    p2[:, NR] = np.tile(bn3b, BLK_B)

    # per-class block-one-hot lane reducer
    csel = np.zeros((NCLS * T1, LANES), np.float32)
    for n in range(NCLS):
        csel[n * T1:(n + 1) * T1, n] = 1.0

    # tail: batch-sum selector for the classifier + classifier bias
    tail = np.zeros((8, LANES), np.float32)
    tail[0:BLK_B, 0:NR] = np.kron(np.eye(BLK_B, dtype=np.float32), np.ones((1, F2), np.float32))
    tail[BLK_B, 0:NCLS] = np.asarray(p["bfc"], np.float32)

    slab = np.concatenate([toep, q, maskx, w3x, wfcx, p1, p2, csel, tail], axis=0)
    assert slab.shape == (SLAB_ROWS, LANES)
    return jnp.asarray(slab, dtype=jnp.float32)


# -------------------------- deterministic parameter construction --------------------------
def make_params():
    ks = jax.random.split(jax.random.PRNGKey(0), 18)

    def nrm(k, shape, s=0.3):
        return s * jax.random.normal(k, shape, dtype=jnp.float32)

    def bn(kg, kb, km, kv, n):
        g = 1.0 + 0.1 * jax.random.normal(kg, (n,), dtype=jnp.float32)
        b = 0.1 * jax.random.normal(kb, (n,), dtype=jnp.float32)
        m = 0.1 * jax.random.normal(km, (n,), dtype=jnp.float32)
        v = 1.0 + jax.random.uniform(kv, (n,), dtype=jnp.float32)
        scale = g / jnp.sqrt(v + EPS)
        shift = b - m * scale
        return scale, shift

    bn1s, bn1b = bn(ks[1], ks[2], ks[3], ks[4], F1)
    bn2s, bn2b = bn(ks[6], ks[7], ks[8], ks[9], F1D)
    bn3s, bn3b = bn(ks[12], ks[13], ks[14], ks[15], F2)

    return dict(
        w1=nrm(ks[0], (F1, K1)),                    # Conv2d(1, F1, (1,K1)) weight (squeezed)
        bn1_scale=bn1s, bn1_shift=bn1b,
        w2=nrm(ks[5], (F1D, C)),                    # Conv2d(F1, F1*D, (C,1), groups=F1) weight
        bn2_scale=bn2s, bn2_shift=bn2b,
        w3=nrm(ks[10], (F1D, K3)),                  # depthwise Conv2d(F1D, F1D, (1,K3), groups=F1D)
        wp=nrm(ks[11], (F2, F1D)),                  # pointwise Conv2d(F1D, F2, (1,1))
        bn3_scale=bn3s, bn3_shift=bn3b,
        wfc=nrm(ks[16], (NCLS, F2 * W)),            # Linear(F2*W, NCLS) weight, channel-major flatten
        bfc=nrm(ks[17], (NCLS,)),                   # Linear bias
    )


# ----------------------------- pure-JAX reference (for checking) --------------------------
def ref_forward(x_nchw, p):
    HI = lax.Precision.HIGHEST
    x = x_nchw[:, 0, :, :].astype(jnp.float32)                           # (Bt, C, T)
    bt = x.shape[0]
    xp = jnp.pad(x, ((0, 0), (0, 0), (L1, R1)))
    h1 = jnp.zeros((bt, F1, C, T), jnp.float32)
    for k in range(K1):
        h1 = h1 + p["w1"][None, :, k, None, None] * xp[:, None, :, k:k + T]
    h1 = h1 * p["bn1_scale"][None, :, None, None] + p["bn1_shift"][None, :, None, None]
    rows = []
    for o in range(F1D):
        rows.append(jnp.sum(p["w2"][o][None, :, None] * h1[:, o // D], axis=1))
    h2 = jnp.stack(rows, axis=1)                                         # (Bt, F1D, T)
    h2 = h2 * p["bn2_scale"][None, :, None] + p["bn2_shift"][None, :, None]
    h2 = _elu(h2)
    h2 = 0.5 * (h2[:, :, 0::2] + h2[:, :, 1::2])                         # (Bt, F1D, T1)
    h2p = jnp.pad(h2, ((0, 0), (0, 0), (L3, R3)))
    h3 = jnp.zeros((bt, F1D, T1), jnp.float32)
    for k in range(K3):
        h3 = h3 + p["w3"][None, :, k, None] * h2p[:, :, k:k + T1]
    h4 = jnp.einsum("fo,bot->bft", p["wp"], h3, precision=HI)
    h4 = h4 * p["bn3_scale"][None, :, None] + p["bn3_shift"][None, :, None]
    h4 = _elu(h4)
    h5 = 0.5 * (h4[:, :, 0::2] + h4[:, :, 1::2])                         # (Bt, F2, W)
    flat = h5.reshape(bt, F2 * W)
    logits = jnp.dot(flat, p["wfc"].T, precision=HI) + p["bfc"][None, :]
    return jax.nn.log_softmax(logits, axis=1)


if __name__ == "__main__":
    params = make_params()
    slab = pack_params(params)                                           # one-time parameter folding
    x = jax.random.normal(jax.random.PRNGKey(0), (BATCH, 1, C, T), dtype=jnp.float32)  # NCHW

    out = jax.block_until_ready(jax.jit(eegnet_classifier_forward)(x, slab))
    ref = jax.block_until_ready(jax.jit(ref_forward)(x, params))

    np.testing.assert_allclose(np.asarray(out), np.asarray(ref), rtol=5e-4, atol=5e-5)
    assert out.shape == (BATCH, NCLS)
    print("KERNEL_OK")
</pallas_src>

<mosaic_0001>
module attributes {stable_mosaic.version = 11 : i64} {
  func.func @eegnet_kernel(%arg0: i32, %arg1: memref<16x32xf32, #tpu.memory_space<vmem>>, %arg2: memref<200x128xf32, #tpu.memory_space<vmem>>, %arg3: memref<8x128xf32, #tpu.memory_space<vmem>>) attributes {dimension_semantics = [#tpu.dimension_semantics<parallel>], iteration_bounds = array<i64: 1>, scalar_prefetch = 0 : i64, scratch_operands = 0 : i64, tpu.core_type = #tpu.core_type<tc>, window_params = [{transform_indices = @transform_0, window_bounds = array<i64: 16, 32>}, {pipeline_mode = #tpu.pipeline_mode<synchronous>, transform_indices = @transform_1, window_bounds = array<i64: 200, 128>}, {transform_indices = @transform_2, window_bounds = array<i64: 8, 128>}]} {
    %c0 = arith.constant 0 : index
    %c0_0 = arith.constant 0 : index
    %0 = vector.load %arg1[%c0, %c0_0] : memref<16x32xf32, #tpu.memory_space<vmem>>, vector<16x32xf32>
    %c0_1 = arith.constant 0 : index
    %c0_2 = arith.constant 0 : index
    %1 = vector.load %arg2[%c0_1, %c0_2] : memref<200x128xf32, #tpu.memory_space<vmem>>, vector<32x128xf32>
    %c32 = arith.constant 32 : index
    %c0_3 = arith.constant 0 : index
    %2 = vector.load %arg2[%c32, %c0_3] : memref<200x128xf32, #tpu.memory_space<vmem>>, vector<32x128xf32>
    %c64 = arith.constant 64 : index
    %c0_4 = arith.constant 0 : index
    %3 = vector.load %arg2[%c64, %c0_4] : memref<200x128xf32, #tpu.memory_space<vmem>>, vector<16x128xf32>
    %c80 = arith.constant 80 : index
    %c0_5 = arith.constant 0 : index
    %4 = vector.load %arg2[%c80, %c0_5] : memref<200x128xf32, #tpu.memory_space<vmem>>, vector<16x128xf32>
    %c96 = arith.constant 96 : index
    %c0_6 = arith.constant 0 : index
    %5 = vector.load %arg2[%c96, %c0_6] : memref<200x128xf32, #tpu.memory_space<vmem>>, vector<16x128xf32>
    %c112 = arith.constant 112 : index
    %c0_7 = arith.constant 0 : index
    %6 = vector.load %arg2[%c112, %c0_7] : memref<200x128xf32, #tpu.memory_space<vmem>>, vector<16x128xf32>
    %c128 = arith.constant 128 : index
    %c0_8 = arith.constant 0 : index
    %7 = vector.load %arg2[%c128, %c0_8] : memref<200x128xf32, #tpu.memory_space<vmem>>, vector<16x128xf32>
    %c144 = arith.constant 144 : index
    %c0_9 = arith.constant 0 : index
    %8 = vector.load %arg2[%c144, %c0_9] : memref<200x128xf32, #tpu.memory_space<vmem>>, vector<48x128xf32>
    %c192 = arith.constant 192 : index
    %c0_10 = arith.constant 0 : index
    %9 = vector.load %arg2[%c192, %c0_10] : memref<200x128xf32, #tpu.memory_space<vmem>>, vector<8x128xf32>
    %10 = vector.extract_strided_slice %6 {offsets = [0, 0], sizes = [16, 16], strides = [1, 1]} : vector<16x128xf32> to vector<16x16xf32>
    %11 = vector.extract_strided_slice %6 {offsets = [0, 16], sizes = [16, 1], strides = [1, 1]} : vector<16x128xf32> to vector<16x1xf32>
    %12 = vector.extract_strided_slice %7 {offsets = [0, 0], sizes = [16, 16], strides = [1, 1]} : vector<16x128xf32> to vector<16x16xf32>
    %13 = vector.extract_strided_slice %7 {offsets = [0, 16], sizes = [16, 1], strides = [1, 1]} : vector<16x128xf32> to vector<16x1xf32>
    %14 = vector.extract_strided_slice %8 {offsets = [0, 0], sizes = [48, 3], strides = [1, 1]} : vector<48x128xf32> to vector<48x3xf32>
    %15 = vector.extract_strided_slice %9 {offsets = [0, 0], sizes = [2, 16], strides = [1, 1]} : vector<8x128xf32> to vector<2x16xf32>
    %16 = vector.extract_strided_slice %9 {offsets = [2, 0], sizes = [1, 3], strides = [1, 1]} : vector<8x128xf32> to vector<1x3xf32>
    %cst = arith.constant dense<0.000000e+00> : vector<16x32xf32>
    %17 = tpu.matmul %10, %0, %cst {dimension_numbers = #tpu.dot_dimension_numbers<[1], [0], [0], [1], [0, 0, 1, 1], [], []>, precision = #tpu.contract_precision<fp32>} : vector<16x16xf32>, vector<16x32xf32>, vector<16x32xf32> -> vector<16x32xf32>
    %cst_11 = arith.constant dense<0.000000e+00> : vector<16x128xf32>
    %18 = tpu.matmul %17, %1, %cst_11 {dimension_numbers = #tpu.dot_dimension_numbers<[1], [0], [0], [1], [0, 0, 1, 1], [], []>, precision = #tpu.contract_precision<fp32>} : vector<16x32xf32>, vector<32x128xf32>, vector<16x128xf32> -> vector<16x128xf32>
    %19 = arith.mulf %18, %3 : vector<16x128xf32>
    %c64_i32 = arith.constant 64 : i32
    %20 = tpu.dynamic_rotate %19 by %c64_i32 dim 1 : vector<16x128xf32>, i32 -> vector<16x128xf32>
    %21 = arith.addf %19, %20 : vector<16x128xf32>
    %c96_i32 = arith.constant 96 : i32
    %22 = tpu.dynamic_rotate %21 by %c96_i32 dim 1 : vector<16x128xf32>, i32 -> vector<16x128xf32>
    %23 = arith.addf %21, %22 : vector<16x128xf32>
    %24 = vector.extract_strided_slice %23 {offsets = [0, 0], sizes = [16, 32], strides = [1, 1]} : vector<16x128xf32> to vector<16x32xf32>
    %25 = vector.broadcast %11 : vector<16x1xf32> to vector<16x32xf32>
    %26 = arith.addf %24, %25 : vector<16x32xf32>
    %cst_12 = arith.constant 0.000000e+00 : f32
    %27 = vector.broadcast %cst_12 : f32 to vector<16x32xf32>
    %28 = arith.cmpf ogt, %26, %27 : vector<16x32xf32>
    %cst_13 = arith.constant 0.000000e+00 : f32
    %29 = vector.broadcast %cst_13 : f32 to vector<16x32xf32>
    %30 = arith.minimumf %26, %29 : vector<16x32xf32>
    %31 = math.exp %30 : vector<16x32xf32>
    %cst_14 = arith.constant 1.000000e+00 : f32
    %32 = vector.broadcast %cst_14 : f32 to vector<16x32xf32>
    %33 = arith.subf %31, %32 : vector<16x32xf32>
    %34 = arith.select %28, %26, %33 : vector<16x32xi1>, vector<16x32xf32>
    %cst_15 = arith.constant dense<0.000000e+00> : vector<16x128xf32>
    %35 = tpu.matmul %34, %2, %cst_15 {dimension_numbers = #tpu.dot_dimension_numbers<[1], [0], [0], [1], [0, 0, 1, 1], [], []>, precision = #tpu.contract_precision<fp32>} : vector<16x32xf32>, vector<32x128xf32>, vector<16x128xf32> -> vector<16x128xf32>
    %36 = arith.mulf %35, %4 : vector<16x128xf32>
    %c16_i32 = arith.constant 16 : i32
    %37 = tpu.dynamic_rotate %36 by %c16_i32 dim 1 : vector<16x128xf32>, i32 -> vector<16x128xf32>
    %38 = arith.addf %36, %37 : vector<16x128xf32>
    %c32_i32 = arith.constant 32 : i32
    %39 = tpu.dynamic_rotate %38 by %c32_i32 dim 1 : vector<16x128xf32>, i32 -> vector<16x128xf32>
    %40 = arith.addf %38, %39 : vector<16x128xf32>
    %c64_i32_16 = arith.constant 64 : i32
    %41 = tpu.dynamic_rotate %40 by %c64_i32_16 dim 1 : vector<16x128xf32>, i32 -> vector<16x128xf32>
    %42 = arith.addf %40, %41 : vector<16x128xf32>
    %cst_17 = arith.constant dense<0.000000e+00> : vector<16x128xf32>
    %43 = tpu.matmul %12, %42, %cst_17 {dimension_numbers = #tpu.dot_dimension_numbers<[1], [0], [0], [1], [0, 0, 1, 1], [], []>, precision = #tpu.contract_precision<fp32>} : vector<16x16xf32>, vector<16x128xf32>, vector<16x128xf32> -> vector<16x128xf32>
    %44 = vector.broadcast %13 : vector<16x1xf32> to vector<16x128xf32>
    %45 = arith.addf %43, %44 : vector<16x128xf32>
    %cst_18 = arith.constant 0.000000e+00 : f32
    %46 = vector.broadcast %cst_18 : f32 to vector<16x128xf32>
    %47 = arith.cmpf ogt, %45, %46 : vector<16x128xf32>
    %cst_19 = arith.constant 0.000000e+00 : f32
    %48 = vector.broadcast %cst_19 : f32 to vector<16x128xf32>
    %49 = arith.minimumf %45, %48 : vector<16x128xf32>
    %50 = math.exp %49 : vector<16x128xf32>
    %cst_20 = arith.constant 1.000000e+00 : f32
    %51 = vector.broadcast %cst_20 : f32 to vector<16x128xf32>
    %52 = arith.subf %50, %51 : vector<16x128xf32>
    %53 = arith.select %47, %45, %52 : vector<16x128xi1>, vector<16x128xf32>
    %54 = arith.mulf %53, %5 : vector<16x128xf32>
    %cst_21 = arith.constant dense<0.000000e+00> : vector<2x128xf32>
    %55 = tpu.matmul %15, %54, %cst_21 {dimension_numbers = #tpu.dot_dimension_numbers<[1], [0], [0], [1], [0, 0, 1, 1], [], []>, precision = #tpu.contract_precision<fp32>} : vector<2x16xf32>, vector<16x128xf32>, vector<2x128xf32> -> vector<2x128xf32>
    %56 = vector.extract_strided_slice %55 {offsets = [0, 0], sizes = [2, 48], strides = [1, 1]} : vector<2x128xf32> to vector<2x48xf32>
    %cst_22 = arith.constant dense<0.000000e+00> : vector<2x3xf32>
    %57 = tpu.matmul %56, %14, %cst_22 {dimension_numbers = #tpu.dot_dimension_numbers<[1], [0], [0], [1], [0, 0, 1, 1], [], []>, precision = #tpu.contract_precision<fp32>} : vector<2x48xf32>, vector<48x3xf32>, vector<2x3xf32> -> vector<2x3xf32>
    %58 = vector.broadcast %16 : vector<1x3xf32> to vector<2x3xf32>
    %59 = arith.addf %57, %58 : vector<2x3xf32>
    %cst_23 = arith.constant dense<0xFF800000> : vector<2xf32>
    %60 = vector.multi_reduction <maximumf>, %59, %cst_23 [1] : vector<2x3xf32> to vector<2xf32>
    %61 = vector.shape_cast %60 : vector<2xf32> to vector<2x1xf32>
    %62 = vector.broadcast %61 : vector<2x1xf32> to vector<2x3xf32>
    %63 = arith.subf %59, %62 : vector<2x3xf32>
    %64 = math.exp %63 : vector<2x3xf32>
    %cst_24 = arith.constant dense<0.000000e+00> : vector<2xf32>
    %65 = vector.multi_reduction <add>, %64, %cst_24 [1] : vector<2x3xf32> to vector<2xf32>
    %66 = vector.shape_cast %65 : vector<2xf32> to vector<2x1xf32>
    %67 = math.log %66 : vector<2x1xf32>
    %68 = arith.addf %61, %67 : vector<2x1xf32>
    %cst_25 = arith.constant 0.000000e+00 : f32
    %69 = vector.broadcast %cst_25 : f32 to vector<8x128xf32>
    %c0_26 = arith.constant 0 : index
    %c0_27 = arith.constant 0 : index
    %70 = vector.load %arg3[%c0_26, %c0_27] : memref<8x128xf32, #tpu.memory_space<vmem>>, vector<8x128xf32>
    tpu.vector_store %arg3[%c0_26, %c0_27], %69 {strides = array<i32>} : memref<8x128xf32, #tpu.memory_space<vmem>>, vector<8x128xf32>,
    %71 = vector.broadcast %68 : vector<2x1xf32> to vector<2x3xf32>
    %72 = arith.subf %59, %71 : vector<2x3xf32>
    %c0_28 = arith.constant 0 : index
    %c0_29 = arith.constant 0 : index
    %73 = vector.load %arg3[%c0_28, %c0_29] : memref<8x128xf32, #tpu.memory_space<vmem>>, vector<2x3xf32>
    tpu.vector_store %arg3[%c0_28, %c0_29], %72 {strides = array<i32>} : memref<8x128xf32, #tpu.memory_space<vmem>>, vector<2x3xf32>,
    return
  }
  func.func @transform_0(%arg0: i32) -> (i32, i32) {
    %c0_i32 = arith.constant 0 : i32
    %c0_i32_0 = arith.constant 0 : i32
    return %arg0, %c0_i32 : i32, i32
  }
  func.func @transform_1(%arg0: i32) -> (i32, i32) {
    %c0_i32 = arith.constant 0 : i32
    %c0_i32_0 = arith.constant 0 : i32
    %c0_i32_1 = arith.constant 0 : i32
    return %c0_i32, %c0_i32_0 : i32, i32
  }
  func.func @transform_2(%arg0: i32) -> (i32, i32) {
    %c0_i32 = arith.constant 0 : i32
    %c0_i32_0 = arith.constant 0 : i32
    return %arg0, %c0_i32 : i32, i32
  }
}

</mosaic_0001>

<bundles_post_ra>
// kernel: eegnet_classifier_forward.1
= control target key start
LH: loop header
LB: loop body
LE: loop exit
PB: predicated region body
PF: predicated region fallthrough
CT: control target
= control target key end

     0   :  { %7 = vsyncpa [#allocation3], 0  ;;  %s4229_s0 = inlined_call_operand.hbm [shape: f32[16,32], index: 0, kind: input, shape index: {}]   ;;  %s4230_s1 = inlined_call_operand.hbm [shape: f32[200,128], index: 1, kind: input, shape index: {}]   ;;  %s4231_s2 = inlined_call_operand.vmem [shape: f32[8,128], index: 2, kind: output, shape index: {}]  }
   0x1   :  { %8 = vsyncpa [#allocation5], 0  ;;  %s3834_s9 = smov [#allocation2]  }
   0x2   :  { %s14_s10 = sshll.u32 %s3834_s9, 4  ;;  %s15_s10 = int_to_ptr.vmem [resolvable:$true] %s14_s10 }
   0x3   :  { %s3798_s11 = scalar_lea.vmem %s15_s10, 256  ;;  %p3803_p1 = scmp.lt.s32.totalorder %s15_s10, %s15_s10 }
   0x4   :  { %p3799_p0 = scmp.ne.s32.totalorder %s15_s10, %s3798_s11  ;;  %p3804_p2 = scmp.lt.s32.totalorder %s3798_s11, %s3798_s11 }
   0x6   :  { %p3805_p3 = por %p3804_p2, %p3803_p1 }
   0x8   :  { %p3806_p4 = pnand %p3805_p3, %p3799_p0 }
   0xa   :  { %3809 = shalt.err (!%p3806_p4)
}
   0xb   :  { %s3835_s12 = smov 128   ;;  %s3836_s13 = smov 8  }
   0xc   :  { %20 = dma.hbm_to_vmem [thread:$0]  %s4229_s0, 256, %s15_s10, [#allocation3], %s3835_s12, %s3835_s12, %s3836_s13  }
   0xd   :  { %s3837_s16 = smov [#allocation4]  }
   0xe   :  { %s26_s17 = sshll.u32 %s3837_s16, 4  ;;  %s27_s17 = int_to_ptr.vmem [resolvable:$true] %s26_s17 }
   0xf   :  { %s3818_s18 = scalar_lea.vmem %s27_s17, 3200  ;;  %p3823_p6 = scmp.lt.s32.totalorder %s27_s17, %s27_s17 }
  0x10   :  { %p3819_p5 = scmp.ne.s32.totalorder %s27_s17, %s3818_s18  ;;  %p3824_p7 = scmp.lt.s32.totalorder %s3818_s18, %s3818_s18 }
  0x12   :  { %p3825_p8 = por %p3824_p7, %p3823_p6 }
  0x14   :  { %p3826_p9 = pnand %p3825_p8, %p3819_p5 }
  0x16   :  { %3829 = shalt.err (!%p3826_p9)
}
  0x17   :  { %32 = dma.hbm_to_vmem [thread:$0]  %s4230_s1, 3200, %s27_s17, [#allocation5], %s3835_s12, %s3835_s12, %s3836_s13  }
  0x18   :  { %3830 = dma.done.wait [#allocation3], 256  }
  0x19   :  { %3831 = vsyncadd [#allocation3], 4294967040 }
  0x1a   :  { %3832 = dma.done.wait [#allocation5], 3200  }
  0x1b   :  { %3833 = vsyncadd [#allocation5], 4294964096  ;;  %vm66_vm0 = vcmask 130048   ;;  %v40_v0 = vld [vmem:[#allocation2 + $0x8] sm:$0xff]  ;;  %v39_v1 = vld [vmem:[#allocation2] sm:$0xff]  ;;  %vm575_vm1 = vcmask 261120  }
  0x1c   :  { %v3866_v2 = vld [vmem:[#allocation4 + $0x70] sm:$0xff]  ;;  %v102_v3 = vand.u32 4294901760, %v40_v0  ;;  %v105_v4 = vand.u32 4294901760, %v39_v1  ;;  %v3870_v6 = vld [vmem:[#allocation4 + $0x78] sm:$0xff]  ;;  %v42_v31 = vld [vmem:[#allocation4 + $0x8] sm:$0xff]  ;;  %s3839_s0 = smov 64  }
  0x1d   :  { %v68_v5 = vsel %vm66_vm0, %v3866_v2, 0  ;;  %v71_v8 = vsel %vm66_vm0, %v3870_v6, 0  ;;  %v44_v26 = vld [vmem:[#allocation4 + $0x18] sm:$0xff]  ;;  %v43_v28 = vld [vmem:[#allocation4 + $0x10] sm:$0xff]  ;;  %v3889_v34 = vand.u32 4294901760, %v42_v31  ;;  %v41_v35 = vld [vmem:[#allocation4] sm:$0xff] }
  0x1e   :  { %v140_v7 = vand.u32 4294901760, %v68_v5  ;;  %3417 = vmatprep.subr.mxu0 %v102_v3  ;;  %v190_v9 = vsub.f32 %v40_v0, %v102_v3  ;;  %v150_v10 = vand.u32 4294901760, %v71_v8  ;;  %v197_v11 = vsub.f32 %v39_v1, %v105_v4  ;;  %s3840_s1 = smov 96   ;;  %s3841_s21 = smov 16  }
  0x1f   :  { %3418 = vmatpush3.msra.mxu0 %v102_v3  ;;  %v3874_v27 = vand.u32 4294901760, %v44_v26  ;;  %v3879_v30 = vand.u32 4294901760, %v43_v28  ;;  %v3899_v38 = vsub.f32 %v42_v31, %v3889_v34  ;;  %v3901_v39 = vand.u32 4294901760, %v41_v35  ;;  %s3842_s22 = smov 32  }
  0x20   :  { %v141_v12 = vsub.f32 %v68_v5, %v140_v7  ;;  %3428 = vmatprep.mubr.f32.mxu1 %v140_v7  ;;  %3419 = vmatprep.subr.mxu0 %v105_v4  ;;  %v191_v13 = vand.u32 4294901760, %v190_v9  ;;  %v151_v14 = vsub.f32 %v71_v8, %v150_v10  ;;  %v198_v15 = vand.u32 4294901760, %v197_v11 }
  0x21   :  { %3420 = vmatpush3.msra.mxu0 %v105_v4  ;;  %v3877_v29 = vsub.f32 %v44_v26, %v3874_v27  ;;  %v3887_v33 = vsub.f32 %v43_v28, %v3879_v30  ;;  %v3908_v42 = vand.u32 4294901760, %v3899_v38  ;;  %v3911_v43 = vsub.f32 %v41_v35, %v3901_v39 }
  0x22   :  { %v142_v16 = vand.u32 4294901760, %v141_v12  ;;  %v192_v17 = vsub.f32 %v190_v9, %v191_v13  ;;  %v152_v18 = vand.u32 4294901760, %v151_v14  ;;  %v199_v19 = vsub.f32 %v197_v11, %v198_v15  ;;  %3431 = vmatprep.subr.mxu0 %v190_v9 }
  0x23   :  { %v3884_v32 = vand.u32 4294901760, %v3877_v29  ;;  %v3896_v37 = vand.u32 4294901760, %v3887_v33  ;;  %v713_v45 = vsub.f32 %v3899_v38, %v3908_v42  ;;  %v3918_v46 = vand.u32 4294901760, %v3911_v43 }
  0x24   :  { %v143_v20 = vsub.f32 %v141_v12, %v142_v16  ;;  %v193_v21 = vand.u32 4294901760, %v192_v17  ;;  %v153_v22 = vsub.f32 %v151_v14, %v152_v18  ;;  %v200_v23 = vand.u32 4294901760, %v199_v19 }
  0x25   :  { %v699_v36 = vsub.f32 %v3877_v29, %v3884_v32  ;;  %v706_v41 = vsub.f32 %v3887_v33, %v3896_v37  ;;  %v714_v47 = vand.u32 4294901760, %v713_v45  ;;  %v720_v48 = vsub.f32 %v3911_v43, %v3918_v46  ;;  %v50_v45 = vld [vmem:[#allocation4 + $0x48] sm:$0xff] }
  0x26   :  { %v144_v24 = vand.u32 4294901760, %v143_v20  ;;  %3424 = vmatprep.subr.mxu1 %v193_v21  ;;  %v154_v25 = vand.u32 4294901760, %v153_v22  ;;  %v3838_v22 = vmov 16   ;;  %vm3844_vm4 = vmmov 0  }
  0x27   :  { %3425 = vmatpush3.msra.mxu1 %v193_v21  ;;  %v700_v40 = vand.u32 4294901760, %v699_v36  ;;  %v707_v44 = vand.u32 4294901760, %v706_v41  ;;  %v721_v49 = vand.u32 4294901760, %v720_v48  ;;  %3776 = vset.pattern.permute.xlu1 %v3838_v22  ;;  %v49_v41 = vld [vmem:[#allocation4 + $0x40] sm:$0xff]  ;;  %vm2696_vm7 = vcmask 392192  }
  0x28   :  { %3421 = vmatprep.mubr.f32.mxu0 %v144_v24  ;;  %3426 = vmatprep.subr.mxu1 %v200_v23  ;;  %vm3211_vm8 = vcmask 17408  }
  0x29   :  { %3422 = vmatmul.mubr.f32.vlgmr.msra.gmra.mxu0 %v154_v25  ;;  %3427 = vmatpush3.msra.mxu1 %v200_v23 }
  0x2a   :  { %3432 = vmatpush3.msra.mxu0 %v190_v9  ;;  %3429 = vmatmul.mubr.f32.vlgmr.msra.gmra.mxu1 %v150_v10 }
  0x2b   :  { %3433 = vmatprep.subr.mxu0 %v197_v11  ;;  %3438 = vmatprep.subr.mxu1 %v102_v3 }
  0x2c   :  { %3434 = vmatpush3.msra.mxu0 %v197_v11  ;;  %3435 = vmatprep.mubr.f32.mxu0 %v141_v12 }
  0x2d   :  { %3439 = vmatpush3.msra.mxu1 %v102_v3  ;;  %3436 = vmatmul.mubr.f32.vlgmr.msra.gmra.mxu0 %v151_v14 }
  0x2e   :  { %3440 = vmatprep.subr.mxu1 %v105_v4  ;;  %3445 = vmatprep.subr.mxu0 %v191_v13 }
  0x2f   :  { %3441 = vmatpush3.msra.mxu1 %v105_v4  ;;  %3442 = vmatprep.mubr.f32.mxu1 %v142_v16 }
  0x30   :  { %3446 = vmatpush3.msra.mxu0 %v191_v13  ;;  %3443 = vmatmul.mubr.f32.vlgmr.msra.gmra.mxu1 %v152_v18 }
  0x31   :  { %3447 = vmatprep.subr.mxu0 %v198_v15  ;;  %3452 = vmatprep.subr.mxu1 %v102_v3 }
  0x32   :  { %3448 = vmatpush3.msra.mxu0 %v198_v15  ;;  %3449 = vmatprep.mubr.f32.mxu0 %v140_v7 }
  0x33   :  { %3453 = vmatpush3.msra.mxu1 %v102_v3  ;;  %3450 = vmatmul.mubr.f32.vlgmr.msra.gmra.mxu0 %v150_v10 }
  0x34   :  { %3454 = vmatprep.subr.mxu1 %v105_v4  ;;  %3456 = vmatprep.mubr.f32.mxu1 %v140_v7 }
  0x35   :  { %3455 = vmatpush3.msra.mxu1 %v105_v4  ;;  %3459 = vmatprep.subr.mxu0 %v3874_v27 }
  0x36   :  { %3457 = vmatmul.mubr.f32.vlgmr.msra.gmra.mxu1 %v150_v10  ;;  %3460 = vmatpush3.msra.mxu0 %v3874_v27 }
  0x37   :  { %3461 = vmatprep.subr.mxu0 %v3879_v30  ;;  %3470 = vmatprep.subr.mxu1 %v700_v40 }
  0x38   :  { %3462 = vmatpush3.msra.mxu0 %v3879_v30  ;;  %3471 = vmatpush3.msra.mxu1 %v700_v40 }
  0x39   :  { %3463 = vmatprep.subr.mxu0 %v3889_v34  ;;  %3472 = vmatprep.subr.mxu1 %v707_v44 }
  0x3a   :  { %3464 = vmatpush3.msra.mxu0 %v3889_v34  ;;  %3473 = vmatpush3.msra.mxu1 %v707_v44 }
  0x3b   :  { %3465 = vmatprep.subr.mxu0 %v3901_v39  ;;  %3474 = vmatprep.subr.mxu1 %v714_v47 }
  0x3c   :  { %3466 = vmatpush3.msra.mxu0 %v3901_v39  ;;  %3475 = vmatpush3.msra.mxu1 %v714_v47 }
  0x3d   :  { %3481 = vmatprep.subr.mxu0 %v3877_v29  ;;  %3476 = vmatprep.subr.mxu1 %v721_v49 }
  0x3e   :  { %3477 = vmatpush3.msra.mxu1 %v721_v49  ;;  %3777 = vset.pattern.permute.xlu0 %v3838_v22  ;;  %v48_v49 = vld [vmem:[#allocation4 + $0x38] sm:$0xff] }
  0x3f   :  { %3492 = vmatprep.subr.mxu1 %v3874_v27  ;;  %1125 = vperm.xlu1 %3776, %v3866_v2  }
  0x43   :  { %1129 = vperm.xlu1 %3776, %v3870_v6  }
  0xe9   :  { %v3423_v50 = vpop.f32.mrf.mxu0 }
  0xea   :  { %v3430_v52 = vpop.f32.mrf.mxu1 }
  0xeb   :  { %v146_v51 = vpop.f32.mrf.mxu0  ;;  %v244_v53 = vadd.f32 %v3430_v52, %v3423_v50  ;;  %v3960_v50 = vand.u32 4294901760, %v48_v49  ;;  %v47_v52 = vld [vmem:[#allocation4 + $0x30] sm:$0xff] }
  0xec   :  { %v237_v54 = vpop.f32.mrf.mxu1 }
  0xed   :  { %v238_v55 = vadd.f32 %v237_v54, %v146_v51  ;;  %v3437_v56 = vpop.f32.mrf.mxu0  ;;  %v3963_v54 = vsub.f32 %v48_v49, %v3960_v50 }
  0xee   :  { %v327_v57 = vadd.f32 %v3437_v56, %v244_v53  ;;  %v46_v56 = vld [vmem:[#allocation4 + $0x28] sm:$0xff] }
  0xef   :  { %v319_v58 = vpop.f32.mrf.mxu0 }
  0xf0   :  { %v320_v59 = vadd.f32 %v319_v58, %v238_v55  ;;  %v3444_v60 = vpop.f32.mrf.mxu1  ;;  %v3965_v55 = vand.u32 4294901760, %v47_v52 }
  0xf1   :  { %v410_v61 = vadd.f32 %v3444_v60, %v327_v57  ;;  %v3970_v57 = vand.u32 4294901760, %v3963_v54  ;;  %v45_v60 = vld [vmem:[#allocation4 + $0x20] sm:$0xff] }
  0xf2   :  { %v401_v62 = vpop.f32.mrf.mxu1  ;;  %v3973_v58 = vsub.f32 %v47_v52, %v3965_v55 }
  0xf3   :  { %v402_v63 = vadd.f32 %v401_v62, %v320_v59  ;;  %v3451_v0 = vpop.f32.mrf.mxu0  ;;  %v3975_v59 = vand.u32 4294901760, %v46_v56 }
  0xf4   :  { %v493_v1 = vadd.f32 %v3451_v0, %v410_v61  ;;  %v1269_v61 = vsub.f32 %v3963_v54, %v3970_v57  ;;  %v3982_v62 = vand.u32 4294901760, %v3973_v58  ;;  %v3987_v0 = vand.u32 4294901760, %v45_v60 }
  0xf5   :  { %v486_v3 = vpop.f32.mrf.mxu0 }
  0xf6   :  { %v3458_v4 = vpop.f32.mrf.mxu1  ;;  %v487_v5 = vadd.f32 %v486_v3, %v402_v63  ;;  %v3985_v63 = vsub.f32 %v46_v56, %v3975_v59  ;;  %v1276_v3 = vsub.f32 %v3973_v58, %v3982_v62 }
  0xf7   :  { %v572_v7 = vadd.f32 %v3458_v4, %v493_v1  ;;  %v1270_v1 = vand.u32 4294901760, %v1269_v61 }
  0xf8   :  { %v565_v8 = vpop.f32.mrf.mxu1  ;;  %v3994_v4 = vand.u32 4294901760, %v3985_v63 }
  0xf9   :  { %v580_v9 = vsel %vm575_vm1, %v572_v7, 0  ;;  %v566_v10 = vadd.f32 %v565_v8, %v487_v5  ;;  %v3997_v5 = vsub.f32 %v45_v60, %v3987_v0  ;;  %v1277_v7 = vand.u32 4294901760, %v1276_v3 }
  0xfa   :  { %v661_v11 = vand.u32 4294901760, %v580_v9  ;;  %v1283_v8 = vsub.f32 %v3985_v63, %v3994_v4 }
  0xfb   :  { %v577_v12 = vsel %vm575_vm1, %v566_v10, 0 }
  0xfc   :  { %v662_v13 = vsub.f32 %v580_v9, %v661_v11  ;;  %v651_v14 = vand.u32 4294901760, %v577_v12  ;;  %v4004_v9 = vand.u32 4294901760, %v3997_v5  ;;  %v1284_v10 = vand.u32 4294901760, %v1283_v8 }
  0xfe   :  { %v652_v15 = vsub.f32 %v577_v12, %v651_v14  ;;  %3478 = vmatprep.mubr.f32.mxu1 %v651_v14  ;;  %v663_v16 = vand.u32 4294901760, %v662_v13 }
  0xff   :  { %3479 = vmatmul.mubr.f32.vlgmr.msra.gmra.mxu1 %v661_v11 }
 0x100   :  { %3493 = vmatpush3.msra.mxu1 %v3874_v27  ;;  %v653_v17 = vand.u32 4294901760, %v652_v15  ;;  %v664_v19 = vsub.f32 %v662_v13, %v663_v16 }
 0x101   :  { %3494 = vmatprep.subr.mxu1 %v3879_v30 }
 0x102   :  { %3495 = vmatpush3.msra.mxu1 %v3879_v30  ;;  %3500 = vmatprep.mubr.f32.mxu1 %v653_v17  ;;  %v654_v18 = vsub.f32 %v652_v15, %v653_v17  ;;  %v665_v21 = vand.u32 4294901760, %v664_v19 }
 0x103   :  { %3496 = vmatprep.subr.mxu1 %v3889_v34 }
 0x104   :  { %3497 = vmatpush3.msra.mxu1 %v3889_v34  ;;  %v655_v20 = vand.u32 4294901760, %v654_v18 }
 0x105   :  { %3498 = vmatprep.subr.mxu1 %v3901_v39 }
 0x106   :  { %3499 = vmatpush3.msra.mxu1 %v3901_v39  ;;  %3467 = vmatprep.mubr.f32.mxu0 %v655_v20 }
 0x107   :  { %3501 = vmatmul.mubr.f32.vlgmr.msra.gmra.mxu1 %v663_v16  ;;  %3514 = vmatprep.subr.mxu1 %v3874_v27 }
 0x108   :  { %3468 = vmatmul.mubr.f32.vlgmr.msra.gmra.mxu0 %v665_v21  ;;  %3515 = vmatpush3.msra.mxu1 %v3874_v27 }
 0x109   :  { %3482 = vmatpush3.msra.mxu0 %v3877_v29  ;;  %3522 = vmatprep.mubr.f32.mxu1 %v651_v14 }
 0x10a   :  { %3483 = vmatprep.subr.mxu0 %v3887_v33  ;;  %3489 = vmatprep.mubr.f32.mxu0 %v652_v15 }
 0x10b   :  { %3516 = vmatprep.subr.mxu1 %v3879_v30  ;;  %3484 = vmatpush3.msra.mxu0 %v3887_v33 }
 0x10c   :  { %3517 = vmatpush3.msra.mxu1 %v3879_v30  ;;  %3485 = vmatprep.subr.mxu0 %v3899_v38 }
 0x10d   :  { %3518 = vmatprep.subr.mxu1 %v3889_v34  ;;  %3486 = vmatpush3.msra.mxu0 %v3899_v38 }
 0x10e   :  { %3519 = vmatpush3.msra.mxu1 %v3889_v34  ;;  %3487 = vmatprep.subr.mxu0 %v3911_v43 }
 0x10f   :  { %3520 = vmatprep.subr.mxu1 %v3901_v39  ;;  %3488 = vmatpush3.msra.mxu0 %v3911_v43 }
 0x110   :  { %3521 = vmatpush3.msra.mxu1 %v3901_v39  ;;  %3490 = vmatmul.mubr.f32.vlgmr.msra.gmra.mxu0 %v662_v13  ;;  %v1126_v13 = vpop.permute.xlu1 %1125 }
 0x111   :  { %3503 = vmatprep.subr.mxu0 %v3884_v32  ;;  %3523 = vmatmul.mubr.f32.vlgmr.msra.gmra.mxu1 %v661_v11 }
 0x112   :  { %3504 = vmatpush3.msra.mxu0 %v3884_v32  ;;  %3511 = vmatprep.mubr.f32.mxu0 %v651_v14 }
 0x113   :  { %3505 = vmatprep.subr.mxu0 %v3896_v37  ;;  %3536 = vmatprep.subr.mxu1 %v1270_v1 }
 0x114   :  { %3506 = vmatpush3.msra.mxu0 %v3896_v37  ;;  %3537 = vmatpush3.msra.mxu1 %v1270_v1  ;;  %v1130_v14 = vpop.permute.xlu1 %1129 }
 0x115   :  { %3507 = vmatprep.subr.mxu0 %v3908_v42  ;;  %3538 = vmatprep.subr.mxu1 %v1277_v7 }
 0x116   :  { %3508 = vmatpush3.msra.mxu0 %v3908_v42  ;;  %3539 = vmatpush3.msra.mxu1 %v1277_v7 }
 0x117   :  { %3509 = vmatprep.subr.mxu0 %v3918_v46  ;;  %3540 = vmatprep.subr.mxu1 %v1284_v10 }
 0x118   :  { %3510 = vmatpush3.msra.mxu0 %v3918_v46  ;;  %3541 = vmatpush3.msra.mxu1 %v1284_v10 }
 0x119   :  { %3512 = vmatmul.mubr.f32.vlgmr.msra.gmra.mxu0 %v661_v11  ;;  %3525 = vmatprep.subr.mxu0 %v3960_v50  ;;  %v1290_v11 = vsub.f32 %v3997_v5, %v4004_v9 }
 0x11a   :  { %3526 = vmatpush3.msra.mxu0 %v3960_v50 }
 0x11b   :  { %3527 = vmatprep.subr.mxu0 %v3965_v55  ;;  %v1291_v12 = vand.u32 4294901760, %v1290_v11 }
 0x11c   :  { %3528 = vmatpush3.msra.mxu0 %v3965_v55 }
 0x11d   :  { %3529 = vmatprep.subr.mxu0 %v3975_v59  ;;  %3542 = vmatprep.subr.mxu1 %v1291_v12 }
 0x11e   :  { %3530 = vmatpush3.msra.mxu0 %v3975_v59  ;;  %3543 = vmatpush3.msra.mxu1 %v1291_v12 }
 0x11f   :  { %3531 = vmatprep.subr.mxu0 %v3987_v0  ;;  %3558 = vmatprep.subr.mxu1 %v3960_v50 }
 0x120   :  { %3532 = vmatpush3.msra.mxu0 %v3987_v0 }
 0x121   :  { %3547 = vmatprep.subr.mxu0 %v3963_v54 }
 0x1bf   :  { %v3480_v24 = vpop.f32.mrf.mxu1 }
 0x1c1   :  { %v758_v27 = vpop.f32.mrf.mxu1 }
 0x1c7   :  { %v3502_v28 = vpop.f32.mrf.mxu1 }
 0x1c8   :  { %v3469_v23 = vpop.f32.mrf.mxu0 }
 0x1c9   :  { %v765_v30 = vadd.f32 %v3480_v24, %v3469_v23  ;;  %v928_v34 = vpop.f32.mrf.mxu1 }
 0x1ca   :  { %v657_v25 = vpop.f32.mrf.mxu0 }
 0x1cb   :  { %v759_v31 = vadd.f32 %v758_v27, %v657_v25 }
 0x1d0   :  { %v3491_v26 = vpop.f32.mrf.mxu0 }
 0x1d1   :  { %v852_v32 = vadd.f32 %v3491_v26, %v765_v30  ;;  %v3524_v35 = vpop.f32.mrf.mxu1 }
 0x1d2   :  { %v844_v29 = vpop.f32.mrf.mxu0 }
 0x1d3   :  { %v845_v33 = vadd.f32 %v844_v29, %v759_v31  ;;  %v937_v37 = vadd.f32 %v3502_v28, %v852_v32  ;;  %v1100_v6 = vpop.f32.mrf.mxu1 }
 0x1d5   :  { %v929_v38 = vadd.f32 %v928_v34, %v845_v33 }
 0x1d9   :  { %v3513_v36 = vpop.f32.mrf.mxu0 }
 0x1da   :  { %v1026_v2 = vadd.f32 %v3513_v36, %v937_v37 }
 0x1db   :  { %v1019_v39 = vpop.f32.mrf.mxu0 }
 0x1dc   :  { %v1020_v40 = vadd.f32 %v1019_v39, %v929_v38  ;;  %v1107_v43 = vadd.f32 %v3524_v35, %v1026_v2 }
 0x1de   :  { %v1101_v42 = vadd.f32 %v1100_v6, %v1020_v40  ;;  %v1111_v46 = vmul.f32 %v1107_v43, %v50_v45 }
 0x1e0   :  { %v1110_v44 = vmul.f32 %v1101_v42, %v49_v41 }
 0x1e2   :  { %1112 = vrot.lane.b32.xlu0 %v1110_v44, %s3839_s0 }
 0x1e6   :  { %1114 = vrot.lane.b32.xlu0 %v1111_v46, %s3839_s0 }
 0x254   :  { %v1113_v47 = vpop.permute.xlu0 %1112 }
 0x255   :  { %v1116_v48 = vadd.f32 %v1113_v47, %v1110_v44 }
 0x257   :  { %1118 = vrot.lane.b32.xlu0 %v1116_v48, %s3840_s1 }
 0x258   :  { %v1115_v51 = vpop.permute.xlu0 %1114 }
 0x259   :  { %v1117_v53 = vadd.f32 %v1115_v51, %v1111_v46 }
 0x25b   :  { %1120 = vrot.lane.b32.xlu1 %v1117_v53, %s3840_s1 }
 0x2c9   :  { %v1119_v15 = vpop.permute.xlu0 %1118 }
 0x2ca   :  { %v1122_v16 = vadd.f32 %v1119_v15, %v1116_v48 }
 0x2cc   :  { %v1132_v17 = vadd.f32 %v1126_v13, %v1122_v16 }
 0x2cd   :  { %v1121_v18 = vpop.permute.xlu1 %1120 }
 0x2ce   :  { %v1136_v19 = vmin.f32 %v1132_v17, 0.0  ;;  %v1123_v20 = vadd.f32 %v1121_v18, %v1117_v53  ;;  %vm1134_vm2 = vcmp.gt.f32.partialorder %v1132_v17, 0.0 }
 0x2d0   :  { %v1138_v21 = vmul.f32 1.442695, %v1136_v19  ;;  %v1133_v22 = vadd.f32 %v1130_v14, %v1123_v20  ;;  %v58_v20 = vld [vmem:[#allocation4 + $0x88] sm:$0xff] }
 0x2d2   :  { %3778 = vpow2.f32 %v1138_v21  ;;  %v1137_v23 = vmin.f32 %v1133_v22, 0.0  ;;  %vm1135_vm3 = vcmp.gt.f32.partialorder %v1133_v22, 0.0  ;;  %v1712_v21 = vsel %vm66_vm0, %v58_v20, 0 }
 0x2d4   :  { %v1140_v24 = vmul.f32 1.442695, %v1137_v23 }
 0x2d6   :  { %3780 = vpow2.f32 %v1140_v24 }
 0x2df   :  { %v3779_v25 = vpop.eup %3778 }
 0x2e0   :  { %v3233_v26 = vadd.f32 -1.0, %v3779_v25 }
 0x2e2   :  { %v1144_v27 = vsel %vm1134_vm2, %v1132_v17, %v3233_v26 }
 0x2e3   :  { %v3781_v28 = vpop.eup %3780  ;;  %v1147_v29 = vsel %vm575_vm1, %v1144_v27, 0 }
 0x2e4   :  { %v3234_v30 = vadd.f32 -1.0, %v3781_v28  ;;  %v1221_v31 = vand.u32 4294901760, %v1147_v29 }
 0x2e6   :  { %v1145_v32 = vsel %vm1135_vm3, %v1133_v22, %v3234_v30  ;;  %3544 = vmatprep.mubr.f32.mxu1 %v1221_v31  ;;  %v1222_v33 = vsub.f32 %v1147_v29, %v1221_v31  ;;  %v1791_v22 = vand.u32 4294901760, %v1712_v21 }
 0x2e7   :  { %v1150_v34 = vsel %vm575_vm1, %v1145_v32, 0 }
 0x2e8   :  { %v1231_v35 = vand.u32 4294901760, %v1150_v34  ;;  %v1223_v36 = vand.u32 4294901760, %v1222_v33  ;;  %v1792_v23 = vsub.f32 %v1712_v21, %v1791_v22 }
 0x2ea   :  { %3545 = vmatmul.mubr.f32.vlgmr.msra.gmra.mxu1 %v1231_v35  ;;  %v1224_v37 = vsub.f32 %v1222_v33, %v1223_v36  ;;  %v1232_v38 = vsub.f32 %v1150_v34, %v1231_v35  ;;  %v1793_v24 = vand.u32 4294901760, %v1792_v23 }
 0x2eb   :  { %3559 = vmatpush3.msra.mxu1 %v3960_v50  ;;  %3566 = vmatprep.mubr.f32.mxu1 %v1223_v36 }
 0x2ec   :  { %3560 = vmatprep.subr.mxu1 %v3965_v55  ;;  %v1225_v39 = vand.u32 4294901760, %v1224_v37  ;;  %v1233_v2 = vand.u32 4294901760, %v1232_v38  ;;  %v1794_v27 = vsub.f32 %v1792_v23, %v1793_v24 }
 0x2ed   :  { %3561 = vmatpush3.msra.mxu1 %v3965_v55 }
 0x2ee   :  { %3562 = vmatprep.subr.mxu1 %v3975_v59  ;;  %3533 = vmatprep.mubr.f32.mxu0 %v1225_v39  ;;  %v1234_v40 = vsub.f32 %v1232_v38, %v1233_v2 }
 0x2ef   :  { %3563 = vmatpush3.msra.mxu1 %v3975_v59 }
 0x2f0   :  { %3564 = vmatprep.subr.mxu1 %v3987_v0  ;;  %v1235_v6 = vand.u32 4294901760, %v1234_v40  ;;  %v3843_v40 = vmov 0.0  }
 0x2f1   :  { %3565 = vmatpush3.msra.mxu1 %v3987_v0  ;;  %3224 = vst [vmem:[%s4231_s2] sm:$0xff] %v3843_v40 }
 0x2f2   :  { %3567 = vmatmul.mubr.f32.vlgmr.msra.gmra.mxu1 %v1233_v2  ;;  %3580 = vmatprep.subr.mxu1 %v3960_v50 }
 0x2f3   :  { %3534 = vmatmul.mubr.f32.vlgmr.msra.gmra.mxu0 %v1235_v6  ;;  %3581 = vmatpush3.msra.mxu1 %v3960_v50 }
 0x2f4   :  { %3548 = vmatpush3.msra.mxu0 %v3963_v54  ;;  %3588 = vmatprep.mubr.f32.mxu1 %v1221_v31 }
 0x2f5   :  { %3549 = vmatprep.subr.mxu0 %v3973_v58  ;;  %3555 = vmatprep.mubr.f32.mxu0 %v1222_v33  ;;  %v1795_v33 = vand.u32 4294901760, %v1794_v27 }
 0x2f6   :  { %3582 = vmatprep.subr.mxu1 %v3965_v55  ;;  %3550 = vmatpush3.msra.mxu0 %v3973_v58 }
 0x2f7   :  { %3583 = vmatpush3.msra.mxu1 %v3965_v55  ;;  %3551 = vmatprep.subr.mxu0 %v3985_v63 }
 0x2f8   :  { %3584 = vmatprep.subr.mxu1 %v3975_v59  ;;  %3552 = vmatpush3.msra.mxu0 %v3985_v63  ;;  %v51_v63 = vld [vmem:[#allocation4 + $0x50] sm:$0xff] }
 0x2f9   :  { %3585 = vmatpush3.msra.mxu1 %v3975_v59  ;;  %3553 = vmatprep.subr.mxu0 %v3997_v5  ;;  %v52_v59 = vld [vmem:[#allocation4 + $0x58] sm:$0xff] }
 0x2fa   :  { %3586 = vmatprep.subr.mxu1 %v3987_v0  ;;  %3554 = vmatpush3.msra.mxu0 %v3997_v5 }
 0x2fb   :  { %3587 = vmatpush3.msra.mxu1 %v3987_v0  ;;  %3556 = vmatmul.mubr.f32.vlgmr.msra.gmra.mxu0 %v1232_v38 }
 0x2fc   :  { %3569 = vmatprep.subr.mxu0 %v3970_v57  ;;  %3589 = vmatmul.mubr.f32.vlgmr.msra.gmra.mxu1 %v1231_v35 }
 0x2fd   :  { %3570 = vmatpush3.msra.mxu0 %v3970_v57  ;;  %3577 = vmatprep.mubr.f32.mxu0 %v1221_v31 }
 0x2fe   :  { %3571 = vmatprep.subr.mxu0 %v3982_v62 }
 0x2ff   :  { %3572 = vmatpush3.msra.mxu0 %v3982_v62 }
 0x300   :  { %3573 = vmatprep.subr.mxu0 %v3994_v4 }
 0x301   :  { %3574 = vmatpush3.msra.mxu0 %v3994_v4  ;;  %v57_v4 = vld [vmem:[#allocation4 + $0x80] sm:$0xff] }
 0x302   :  { %3575 = vmatprep.subr.mxu0 %v4004_v9  ;;  %v1710_v5 = vsel %vm66_vm0, %v57_v4, 0 }
 0x303   :  { %3576 = vmatpush3.msra.mxu0 %v4004_v9  ;;  %v4043_v7 = vand.u32 4294901760, %v1710_v5 }
 0x304   :  { %3578 = vmatmul.mubr.f32.vlgmr.msra.gmra.mxu0 %v1231_v35 }
 0x305   :  { %3602 = vmatprep.mubr.f32.mxu1 %v4043_v7  ;;  %v1782_v12 = vsub.f32 %v1710_v5, %v4043_v7 }
 0x307   :  { %v1783_v13 = vand.u32 4294901760, %v1782_v12 }
 0x309   :  { %v1784_v14 = vsub.f32 %v1782_v12, %v1783_v13 }
 0x30b   :  { %v1785_v15 = vand.u32 4294901760, %v1784_v14  ;;  %v54_v14 = vld [vmem:[#allocation4 + $0x68] sm:$0xff] }
 0x30d   :  { %3595 = vmatprep.mubr.f32.mxu0 %v1785_v15 }
 0x3aa   :  { %v3546_v42 = vpop.f32.mrf.mxu1 }
 0x3ac   :  { %v1328_v45 = vpop.f32.mrf.mxu1 }
 0x3b2   :  { %v3568_v47 = vpop.f32.mrf.mxu1 }
 0x3b3   :  { %v3535_v41 = vpop.f32.mrf.mxu0 }
 0x3b4   :  { %v1335_v46 = vadd.f32 %v3546_v42, %v3535_v41  ;;  %v1498_v52 = vpop.f32.mrf.mxu1 }
 0x3b5   :  { %v1227_v43 = vpop.f32.mrf.mxu0 }
 0x3b6   :  { %v1329_v49 = vadd.f32 %v1328_v45, %v1227_v43 }
 0x3bb   :  { %v3557_v44 = vpop.f32.mrf.mxu0 }
 0x3bc   :  { %v1422_v50 = vadd.f32 %v3557_v44, %v1335_v46  ;;  %v3590_v54 = vpop.f32.mrf.mxu1 }
 0x3bd   :  { %v1414_v48 = vpop.f32.mrf.mxu0 }
 0x3be   :  { %v1415_v51 = vadd.f32 %v1414_v48, %v1329_v49  ;;  %v1507_v53 = vadd.f32 %v3568_v47, %v1422_v50  ;;  %v1670_v62 = vpop.f32.mrf.mxu1 }
 0x3c0   :  { %v1499_v57 = vadd.f32 %v1498_v52, %v1415_v51 }
 0x3c4   :  { %v3579_v55 = vpop.f32.mrf.mxu0 }
 0x3c5   :  { %v1596_v56 = vadd.f32 %v3579_v55, %v1507_v53 }
 0x3c6   :  { %v1589_v58 = vpop.f32.mrf.mxu0 }
 0x3c7   :  { %v1677_v60 = vadd.f32 %v3590_v54, %v1596_v56  ;;  %v1590_v61 = vadd.f32 %v1589_v58, %v1499_v57 }
 0x3c9   :  { %v1671_v0 = vadd.f32 %v1670_v62, %v1590_v61  ;;  %v1681_v1 = vmul.f32 %v1677_v60, %v52_v59 }
 0x3cb   :  { %1684 = vrot.lane.b32.xlu0 %v1681_v1, %s3841_s21  ;;  %v1680_v3 = vmul.f32 %v1671_v0, %v51_v63 }
 0x3cd   :  { %1682 = vrot.lane.b32.xlu1 %v1680_v3, %s3841_s21 }
 0x43d   :  { %v1685_v8 = vpop.permute.xlu0 %1684 }
 0x43e   :  { %v1687_v9 = vadd.f32 %v1685_v8, %v1681_v1 }
 0x43f   :  { %v1683_v10 = vpop.permute.xlu1 %1682 }
 0x440   :  { %v1686_v11 = vadd.f32 %v1683_v10, %v1680_v3  ;;  %1690 = vrot.lane.b32.xlu0 %v1687_v9, %s3842_s22 }
 0x442   :  { %1688 = vrot.lane.b32.xlu1 %v1686_v11, %s3842_s22 }
 0x4b2   :  { %v1691_v16 = vpop.permute.xlu0 %1690 }
 0x4b3   :  { %v1693_v17 = vadd.f32 %v1691_v16, %v1687_v9 }
 0x4b4   :  { %v1689_v18 = vpop.permute.xlu1 %1688 }
 0x4b5   :  { %v1692_v19 = vadd.f32 %v1689_v18, %v1686_v11  ;;  %1696 = vrot.lane.b32.xlu0 %v1693_v17, %s3839_s0  ;;  %v53_v18 = vld [vmem:[#allocation4 + $0x60] sm:$0xff] }
 0x4b7   :  { %1694 = vrot.lane.b32.xlu1 %v1692_v19, %s3839_s0 }
 0x4b9   :  { %1707 = vperm.xlu0 %3777, %v58_v20  }
 0x4bb   :  { %1702 = vperm.xlu1 %3776, %v57_v4  }
 0x527   :  { %v1697_v25 = vpop.permute.xlu0 %1696 }
 0x528   :  { %v1699_v26 = vadd.f32 %v1697_v25, %v1693_v17 }
 0x529   :  { %v1695_v28 = vpop.permute.xlu1 %1694 }
 0x52a   :  { %v1743_v29 = vand.u32 4294901760, %v1699_v26  ;;  %v1698_v30 = vadd.f32 %v1695_v28, %v1692_v19 }
 0x52c   :  { %v1831_v31 = vsub.f32 %v1699_v26, %v1743_v29  ;;  %v1746_v32 = vand.u32 4294901760, %v1698_v30  ;;  %3591 = vmatprep.subr.mxu0 %v1743_v29 }
 0x52d   :  { %3592 = vmatpush3.msra.mxu0 %v1743_v29 }
 0x52e   :  { %v1838_v34 = vsub.f32 %v1698_v30, %v1746_v32  ;;  %3593 = vmatprep.subr.mxu0 %v1746_v32  ;;  %v1832_v35 = vand.u32 4294901760, %v1831_v31 }
 0x52f   :  { %3594 = vmatpush3.msra.mxu0 %v1746_v32 }
 0x530   :  { %3596 = vmatmul.mubr.f32.vlgmr.msra.gmra.mxu0 %v1795_v33  ;;  %3605 = vmatprep.subr.mxu0 %v1831_v31  ;;  %v1833_v36 = vsub.f32 %v1831_v31, %v1832_v35  ;;  %v1839_v37 = vand.u32 4294901760, %v1838_v34 }
 0x531   :  { %3606 = vmatpush3.msra.mxu0 %v1831_v31  ;;  %3609 = vmatprep.mubr.f32.mxu0 %v1782_v12 }
 0x532   :  { %3607 = vmatprep.subr.mxu0 %v1838_v34  ;;  %v1834_v38 = vand.u32 4294901760, %v1833_v36  ;;  %v1840_v39 = vsub.f32 %v1838_v34, %v1839_v37 }
 0x533   :  { %3608 = vmatpush3.msra.mxu0 %v1838_v34 }
 0x534   :  { %3598 = vmatprep.subr.mxu1 %v1834_v38  ;;  %3619 = vmatprep.subr.mxu0 %v1832_v35  ;;  %v1841_v2 = vand.u32 4294901760, %v1840_v39  ;;  %v1708_v41 = vpop.permute.xlu0 %1707 }
 0x535   :  { %3599 = vmatpush3.msra.mxu1 %v1834_v38  ;;  %3610 = vmatmul.mubr.f32.vlgmr.msra.gmra.mxu0 %v1792_v23 }
 0x536   :  { %3620 = vmatpush3.msra.mxu0 %v1832_v35  ;;  %3600 = vmatprep.subr.mxu1 %v1841_v2  ;;  %v1703_v45 = vpop.permute.xlu1 %1702  ;;  %v64_v35 = vld [vmem:[#allocation4 + $0xb8] sm:$0xff] }
 0x537   :  { %3621 = vmatprep.subr.mxu0 %v1839_v37  ;;  %3601 = vmatpush3.msra.mxu1 %v1841_v2  ;;  %v4090_v36 = vand.u32 4294901760, %v64_v35  ;;  %v62_v2 = vld [vmem:[#allocation4 + $0xa8] sm:$0xff] }
 0x538   :  { %3622 = vmatpush3.msra.mxu0 %v1839_v37  ;;  %3603 = vmatmul.mubr.f32.vlgmr.msra.gmra.mxu1 %v1791_v22  ;;  %v63_v37 = vld [vmem:[#allocation4 + $0xb0] sm:$0xff] }
 0x539   :  { %3612 = vmatprep.subr.mxu1 %v1743_v29  ;;  %3616 = vmatprep.mubr.f32.mxu1 %v1783_v13  ;;  %v4093_v38 = vsub.f32 %v64_v35, %v4090_v36  ;;  %v4095_v39 = vand.u32 4294901760, %v63_v37 }
 0x53a   :  { %3613 = vmatpush3.msra.mxu1 %v1743_v29  ;;  %3623 = vmatprep.mubr.f32.mxu0 %v4043_v7 }
 0x53b   :  { %3614 = vmatprep.subr.mxu1 %v1746_v32  ;;  %3624 = vmatmul.mubr.f32.vlgmr.msra.gmra.mxu0 %v1791_v22 }
 0x53c   :  { %3615 = vmatpush3.msra.mxu1 %v1746_v32  ;;  %3633 = vmatprep.subr.mxu0 %v3843_v40 }
 0x53d   :  { %3617 = vmatmul.mubr.f32.vlgmr.msra.gmra.mxu1 %v1793_v24  ;;  %3626 = vmatprep.subr.mxu1 %v1743_v29 }
 0x53e   :  { %3627 = vmatpush3.msra.mxu1 %v1743_v29  ;;  %3630 = vmatprep.mubr.f32.mxu1 %v4043_v7  ;;  %v4062_v7 = vld [vmem:[#allocation4 + $0xc0] sm:$0xff] }
 0x53f   :  { %3628 = vmatprep.subr.mxu1 %v1746_v32  ;;  %3637 = vmatprep.mubr.msk.f32.mxu0 %vm3844_vm4, %v3843_v40  ;;  %v2231_v9 = vsel %vm66_vm0, %v4062_v7, 0 }
 0x540   :  { %3629 = vmatpush3.msra.mxu1 %v1746_v32  ;;  %v2300_v10 = vand.u32 4294901760, %v2231_v9 }
 0x541   :  { %3631 = vmatmul.mubr.f32.vlgmr.msra.gmra.mxu1 %v1791_v22  ;;  %3640 = vmatprep.subr.mxu1 %v3843_v40 }
 0x542   :  { %3644 = vmatprep.mubr.msk.f32.mxu1 %vm3844_vm4, %v3843_v40  ;;  %v2301_v11 = vsub.f32 %v2231_v9, %v2300_v10 }
 0x544   :  { %v2302_v12 = vand.u32 4294901760, %v2301_v11 }
 0x546   :  { %v2303_v20 = vsub.f32 %v2301_v11, %v2302_v12 }
 0x548   :  { %v2304_v25 = vand.u32 4294901760, %v2303_v20 }
 0x5f0   :  { %v3597_v6 = vpop.f32.mrf.mxu0 }
 0x5f1   :  { %v1798_v43 = vadd.f32 %v3597_v6, %v1708_v41  ;;  %v2804_v6 = vand.u32 4294901760, %v4093_v38  ;;  %v4101_v41 = vsub.f32 %v63_v37, %v4095_v39 }
 0x5f2   :  { %v1787_v42 = vpop.f32.mrf.mxu0 }
 0x5f3   :  { %v1788_v47 = vadd.f32 %v1787_v42, %v1703_v45  ;;  %v4103_v42 = vand.u32 4294901760, %v62_v2  ;;  %v2811_v45 = vand.u32 4294901760, %v4101_v41 }
 0x5f5   :  { %v3611_v44 = vpop.f32.mrf.mxu0 }
 0x5f7   :  { %v1960_v49 = vpop.f32.mrf.mxu0 }
 0x5f8   :  { %v3604_v46 = vpop.f32.mrf.mxu1 }
 0x5f9   :  { %v1885_v48 = vadd.f32 %v3604_v46, %v1798_v43  ;;  %v61_v43 = vld [vmem:[#allocation4 + $0xa0] sm:$0xff]  ;;  %v4112_v46 = vsub.f32 %v62_v2, %v4103_v42 }
 0x5fa   :  { %v1878_v50 = vpop.f32.mrf.mxu1 }
 0x5fb   :  { %v1968_v51 = vadd.f32 %v3611_v44, %v1885_v48  ;;  %v1879_v52 = vadd.f32 %v1878_v50, %v1788_v47  ;;  %v3625_v55 = vpop.f32.mrf.mxu0  ;;  %v2805_v44 = vsub.f32 %v4093_v38, %v2804_v6  ;;  %v4114_v47 = vand.u32 4294901760, %v61_v43  ;;  %v60_v48 = vld [vmem:[#allocation4 + $0x98] sm:$0xff] }
 0x5fc   :  { %v2812_v50 = vsub.f32 %v4101_v41, %v2811_v45 }
 0x5fd   :  { %v1961_v53 = vadd.f32 %v1960_v49, %v1879_v52  ;;  %v3618_v54 = vpop.f32.mrf.mxu1  ;;  %v2127_v60 = vpop.f32.mrf.mxu0  ;;  %v2806_v49 = vand.u32 4294901760, %v2805_v44  ;;  %v4123_v52 = vsub.f32 %v61_v43, %v4114_v47 }
 0x5fe   :  { %v2051_v56 = vadd.f32 %v3618_v54, %v1968_v51  ;;  %v2818_v51 = vand.u32 4294901760, %v4112_v46  ;;  %v59_v54 = vld [vmem:[#allocation4 + $0x90] sm:$0xff] }
 0x5ff   :  { %v2042_v57 = vpop.f32.mrf.mxu1 }
 0x600   :  { %v2134_v58 = vadd.f32 %v3625_v55, %v2051_v56  ;;  %v2043_v59 = vadd.f32 %v2042_v57, %v1961_v53  ;;  %v4126_v53 = vand.u32 4294901760, %v60_v48  ;;  %v2813_v55 = vand.u32 4294901760, %v2812_v50 }
 0x601   :  { %v3632_v61 = vpop.f32.mrf.mxu1  ;;  %v2819_v56 = vsub.f32 %v4112_v46, %v2818_v51  ;;  %v2825_v57 = vand.u32 4294901760, %v4123_v52 }
 0x602   :  { %v2128_v62 = vadd.f32 %v2127_v60, %v2043_v59  ;;  %v2213_v63 = vadd.f32 %v3632_v61, %v2134_v58  ;;  %v4133_v58 = vand.u32 4294901760, %v59_v54  ;;  %v4137_v59 = vsub.f32 %v60_v48, %v4126_v53 }
 0x603   :  { %v2206_v0 = vpop.f32.mrf.mxu1  ;;  %v2820_v60 = vand.u32 4294901760, %v2819_v56  ;;  %v2826_v61 = vsub.f32 %v4123_v52, %v2825_v57 }
 0x604   :  { %v2219_v1 = vmin.f32 %v2213_v63, 0.0  ;;  %v2207_v3 = vadd.f32 %v2206_v0, %v2128_v62  ;;  %vm2217_vm5 = vcmp.gt.f32.partialorder %v2213_v63, 0.0  ;;  %v4144_v62 = vsub.f32 %v59_v54, %v4133_v58 }
 0x605   :  { %v2827_v0 = vand.u32 4294901760, %v2826_v61 }
 0x606   :  { %v2222_v4 = vmul.f32 1.442695, %v2219_v1  ;;  %v2218_v5 = vmin.f32 %v2207_v3, 0.0  ;;  %vm2216_vm6 = vcmp.gt.f32.partialorder %v2207_v3, 0.0  ;;  %v2839_v1 = vand.u32 4294901760, %v4144_v62 }
 0x608   :  { %3782 = vpow2.f32 %v2222_v4  ;;  %v2220_v8 = vmul.f32 1.442695, %v2218_v5  ;;  %v2840_v4 = vsub.f32 %v4144_v62, %v2839_v1 }
 0x60a   :  { %3784 = vpow2.f32 %v2220_v8  ;;  %v2841_v8 = vand.u32 4294901760, %v2840_v4 }
 0x615   :  { %v3783_v13 = vpop.eup %3782 }
 0x616   :  { %v3236_v15 = vadd.f32 -1.0, %v3783_v13 }
 0x617   :  { %v3785_v16 = vpop.eup %3784 }
 0x618   :  { %v2227_v17 = vsel %vm2217_vm5, %v2213_v63, %v3236_v15  ;;  %v3235_v19 = vadd.f32 -1.0, %v3785_v16  ;;  %v2832_v63 = vand.u32 4294901760, %v4137_v59 }
 0x619   :  { %v2229_v21 = vmul.f32 %v2227_v17, %v54_v14 }
 0x61a   :  { %v2226_v22 = vsel %vm2216_vm6, %v2207_v3, %v3235_v19  ;;  %v2833_v3 = vsub.f32 %v4137_v59, %v2832_v63 }
 0x61b   :  { %v2228_v23 = vmul.f32 %v2226_v22, %v53_v18  ;;  %v2262_v24 = vand.u32 4294901760, %v2229_v21 }
 0x61c   :  { %v2834_v5 = vand.u32 4294901760, %v2833_v3 }
 0x61d   :  { %3634 = vmatpush3.msra.mxu0 %v2262_v24  ;;  %v2265_v26 = vand.u32 4294901760, %v2228_v23  ;;  %v2340_v27 = vsub.f32 %v2229_v21, %v2262_v24 }
 0x61e   :  { %3635 = vmatprep.subr.mxu0 %v3843_v40 }
 0x61f   :  { %3636 = vmatpush3.msra.mxu0 %v2265_v26  ;;  %v2347_v28 = vsub.f32 %v2228_v23, %v2265_v26  ;;  %v2341_v29 = vand.u32 4294901760, %v2340_v27 }
 0x620   :  { %3647 = vmatprep.subr.mxu0 %v3843_v40  ;;  %3638 = vmatmul.mubr.f32.vlgmr.msra.gmra.mxu0 %v2304_v25 }
 0x621   :  { %3648 = vmatpush3.msra.mxu0 %v2340_v27  ;;  %3651 = vmatprep.mubr.msk.f32.mxu0 %vm3844_vm4, %v3843_v40  ;;  %v2342_v30 = vsub.f32 %v2340_v27, %v2341_v29  ;;  %v2348_v31 = vand.u32 4294901760, %v2347_v28 }
 0x622   :  { %3649 = vmatprep.subr.mxu0 %v3843_v40 }
 0x623   :  { %3650 = vmatpush3.msra.mxu0 %v2347_v28  ;;  %v2343_v32 = vand.u32 4294901760, %v2342_v30  ;;  %v2349_v33 = vsub.f32 %v2347_v28, %v2348_v31 }
 0x624   :  { %3661 = vmatprep.subr.mxu0 %v3843_v40  ;;  %3652 = vmatmul.mubr.f32.vlgmr.msra.gmra.mxu0 %v2301_v11 }
 0x625   :  { %3641 = vmatpush3.msra.mxu1 %v2343_v32  ;;  %3662 = vmatpush3.msra.mxu0 %v2341_v29  ;;  %v2350_v34 = vand.u32 4294901760, %v2349_v33 }
 0x626   :  { %3642 = vmatprep.subr.mxu1 %v3843_v40  ;;  %3663 = vmatprep.subr.mxu0 %v3843_v40 }
 0x627   :  { %3643 = vmatpush3.msra.mxu1 %v2350_v34  ;;  %3664 = vmatpush3.msra.mxu0 %v2348_v31  ;;  %v2692_v34 = vlaneseq }
 0x628   :  { %3645 = vmatmul.mubr.f32.vlgmr.msra.gmra.mxu1 %v2300_v10  ;;  %3654 = vmatprep.subr.mxu1 %v3843_v40 }
 0x629   :  { %3655 = vmatpush3.msra.mxu1 %v2262_v24  ;;  %3658 = vmatprep.mubr.msk.f32.mxu1 %vm3844_vm4, %v3843_v40  ;;  %v2693_v37 = vshrl.u32 %v2692_v34, 7 }
 0x62a   :  { %3656 = vmatprep.subr.mxu1 %v3843_v40  ;;  %3665 = vmatprep.mubr.msk.f32.mxu0 %vm3844_vm4, %v3843_v40 }
 0x62b   :  { %3657 = vmatpush3.msra.mxu1 %v2265_v26  ;;  %3666 = vmatmul.mubr.f32.vlgmr.msra.gmra.mxu0 %v2300_v10  ;;  %v2694_v2 = vsub.s32 2, %v2693_v37 }
 0x62c   :  { %3659 = vmatmul.mubr.f32.vlgmr.msra.gmra.mxu1 %v2302_v12  ;;  %3668 = vmatprep.subr.mxu1 %v3843_v40 }
 0x62d   :  { %3669 = vmatpush3.msra.mxu1 %v2262_v24  ;;  %3672 = vmatprep.mubr.msk.f32.mxu1 %vm3844_vm4, %v3843_v40 }
 0x62e   :  { %3670 = vmatprep.subr.mxu1 %v3843_v40  ;;  %3675 = vmatprep.subr.mxu0 %v3843_v40 }
 0x62f   :  { %3671 = vmatpush3.msra.mxu1 %v2265_v26  ;;  %3687 = vmatprep.mubr.msk.f32.mxu0 %vm3844_vm4, %v3843_v40 }
 0x630   :  { %3673 = vmatmul.mubr.f32.vlgmr.msra.gmra.mxu1 %v2300_v10  ;;  %3690 = vmatprep.subr.mxu1 %v3843_v40 }
 0x631   :  { %3702 = vmatprep.mubr.msk.f32.mxu1 %vm3844_vm4, %v3843_v40  ;;  %3676 = vmatpush3.msra.mxu0 %v4090_v36 }
 0x632   :  { %3677 = vmatprep.subr.mxu0 %v3843_v40  ;;  %3691 = vmatpush3.msra.mxu1 %v2806_v49 }
 0x633   :  { %3678 = vmatpush3.msra.mxu0 %v4095_v39  ;;  %3692 = vmatprep.subr.mxu1 %v3843_v40 }
 0x634   :  { %3679 = vmatprep.subr.mxu0 %v3843_v40  ;;  %3693 = vmatpush3.msra.mxu1 %v2813_v55 }
 0x635   :  { %3680 = vmatpush3.msra.mxu0 %v4103_v42  ;;  %3694 = vmatprep.subr.mxu1 %v3843_v40 }
 0x636   :  { %3681 = vmatprep.subr.mxu0 %v3843_v40  ;;  %3695 = vmatpush3.msra.mxu1 %v2820_v60 }
 0x637   :  { %3682 = vmatpush3.msra.mxu0 %v4114_v47  ;;  %3696 = vmatprep.subr.mxu1 %v3843_v40 }
 0x638   :  { %3683 = vmatprep.subr.mxu0 %v3843_v40  ;;  %3697 = vmatpush3.msra.mxu1 %v2827_v0 }
 0x639   :  { %3684 = vmatpush3.msra.mxu0 %v4126_v53  ;;  %3698 = vmatprep.subr.mxu1 %v3843_v40 }
 0x63a   :  { %3685 = vmatprep.subr.mxu0 %v3843_v40  ;;  %3699 = vmatpush3.msra.mxu1 %v2834_v5 }
 0x63b   :  { %3686 = vmatpush3.msra.mxu0 %v4133_v58  ;;  %3700 = vmatprep.subr.mxu1 %v3843_v40 }
 0x63c   :  { %3705 = vmatprep.subr.mxu0 %v3843_v40  ;;  %3701 = vmatpush3.msra.mxu1 %v2841_v8 }
 0x63d   :  { %3720 = vmatprep.subr.mxu1 %v3843_v40 }
 0x6e0   :  { %v2306_v9 = vpop.f32.mrf.mxu0 }
 0x6e2   :  { %v3639_v10 = vpop.f32.mrf.mxu0 }
 0x6e4   :  { %v2463_v11 = vpop.f32.mrf.mxu0 }
 0x6e6   :  { %v3653_v12 = vpop.f32.mrf.mxu0 }
 0x6e8   :  { %v2387_v13 = vpop.f32.mrf.mxu1 }
 0x6e9   :  { %v2388_v14 = vadd.f32 %v2387_v13, %v2306_v9 }
 0x6ea   :  { %v3646_v15 = vpop.f32.mrf.mxu1 }
 0x6eb   :  { %v2464_v16 = vadd.f32 %v2463_v11, %v2388_v14  ;;  %v2615_v17 = vpop.f32.mrf.mxu0 }
 0x6ec   :  { %v2538_v18 = vpop.f32.mrf.mxu1 }
 0x6ed   :  { %v2539_v19 = vadd.f32 %v2538_v18, %v2464_v16  ;;  %v3667_v20 = vpop.f32.mrf.mxu0 }
 0x6ee   :  { %v3660_v21 = vpop.f32.mrf.mxu1 }
 0x6ef   :  { %v2616_v22 = vadd.f32 %v2615_v17, %v2539_v19 }
 0x6f0   :  { %v2688_v23 = vpop.f32.mrf.mxu1 }
 0x6f1   :  { %v2689_v24 = vadd.f32 %v2688_v23, %v2616_v22 }
 0x6f2   :  { %v3674_v25 = vpop.f32.mrf.mxu1 }
 0x6f3   :  { %v2698_v26 = vsel %vm2696_vm7, %v2689_v24, 0 }
 0x6f4   :  { %v2771_v27 = vand.u32 4294901760, %v2698_v26 }
 0x6f6   :  { %v2772_v28 = vsub.f32 %v2698_v26, %v2771_v27  ;;  %3703 = vmatmul.mubr.f32.vlgmr.msra.gmra.mxu1 %v2771_v27 }
 0x6f7   :  { %3721 = vmatpush3.msra.mxu1 %v4090_v36  ;;  %3732 = vmatprep.mubr.msk.f32.mxu1 %vm3844_vm4, %v3843_v40 }
 0x6f8   :  { %v2773_v29 = vand.u32 4294901760, %v2772_v28  ;;  %3722 = vmatprep.subr.mxu1 %v3843_v40 }
 0x6f9   :  { %3723 = vmatpush3.msra.mxu1 %v4095_v39 }
 0x6fa   :  { %3724 = vmatprep.subr.mxu1 %v3843_v40  ;;  %v2774_v30 = vsub.f32 %v2772_v28, %v2773_v29 }
 0x6fb   :  { %3725 = vmatpush3.msra.mxu1 %v4103_v42 }
 0x6fc   :  { %3726 = vmatprep.subr.mxu1 %v3843_v40  ;;  %v2775_v31 = vand.u32 4294901760, %v2774_v30 }
 0x6fd   :  { %3727 = vmatpush3.msra.mxu1 %v4114_v47 }
 0x6fe   :  { %3728 = vmatprep.subr.mxu1 %v3843_v40  ;;  %3688 = vmatmul.mubr.f32.vlgmr.msra.gmra.mxu0 %v2775_v31 }
 0x6ff   :  { %3706 = vmatpush3.msra.mxu0 %v4093_v38  ;;  %3729 = vmatpush3.msra.mxu1 %v4126_v53 }
 0x700   :  { %3707 = vmatprep.subr.mxu0 %v3843_v40  ;;  %3730 = vmatprep.subr.mxu1 %v3843_v40 }
 0x701   :  { %3708 = vmatpush3.msra.mxu0 %v4101_v41  ;;  %3731 = vmatpush3.msra.mxu1 %v4133_v58 }
 0x702   :  { %3709 = vmatprep.subr.mxu0 %v3843_v40  ;;  %3733 = vmatmul.mubr.f32.vlgmr.msra.gmra.mxu1 %v2773_v29 }
 0x703   :  { %3750 = vmatprep.subr.mxu1 %v3843_v40  ;;  %3710 = vmatpush3.msra.mxu0 %v4112_v46 }
 0x704   :  { %3751 = vmatpush3.msra.mxu1 %v4090_v36  ;;  %3711 = vmatprep.subr.mxu0 %v3843_v40 }
 0x705   :  { %3752 = vmatprep.subr.mxu1 %v3843_v40  ;;  %3712 = vmatpush3.msra.mxu0 %v4123_v52 }
 0x706   :  { %3753 = vmatpush3.msra.mxu1 %v4095_v39  ;;  %3713 = vmatprep.subr.mxu0 %v3843_v40 }
 0x707   :  { %3754 = vmatprep.subr.mxu1 %v3843_v40  ;;  %3714 = vmatpush3.msra.mxu0 %v4137_v59 }
 0x708   :  { %3755 = vmatpush3.msra.mxu1 %v4103_v42  ;;  %3715 = vmatprep.subr.mxu0 %v3843_v40 }
 0x709   :  { %3756 = vmatprep.subr.mxu1 %v3843_v40  ;;  %3716 = vmatpush3.msra.mxu0 %v4144_v62 }
 0x70a   :  { %3717 = vmatprep.mubr.msk.f32.mxu0 %vm3844_vm4, %v3843_v40  ;;  %3757 = vmatpush3.msra.mxu1 %v4114_v47 }
 0x70b   :  { %3718 = vmatmul.mubr.f32.vlgmr.msra.gmra.mxu0 %v2772_v28  ;;  %3735 = vmatprep.subr.mxu0 %v3843_v40 }
 0x70c   :  { %3758 = vmatprep.subr.mxu1 %v3843_v40  ;;  %3736 = vmatpush3.msra.mxu0 %v2804_v6  ;;  %v2695_v6 = vrot.slane %v4062_v7, %v2694_v2 }
 0x70d   :  { %3759 = vmatpush3.msra.mxu1 %v4126_v53  ;;  %3737 = vmatprep.subr.mxu0 %v3843_v40 }
 0x70e   :  { %3760 = vmatprep.subr.mxu1 %v3843_v40  ;;  %3738 = vmatpush3.msra.mxu0 %v2811_v45 }
 0x70f   :  { %3761 = vmatpush3.msra.mxu1 %v4133_v58  ;;  %3762 = vmatprep.mubr.msk.f32.mxu1 %vm3844_vm4, %v3843_v40 }
 0x710   :  { %3739 = vmatprep.subr.mxu0 %v3843_v40  ;;  %3763 = vmatmul.mubr.f32.vlgmr.msra.gmra.mxu1 %v2771_v27 }
 0x711   :  { %3740 = vmatpush3.msra.mxu0 %v2818_v51  ;;  %3747 = vmatprep.mubr.msk.f32.mxu0 %vm3844_vm4, %v3843_v40 }
 0x712   :  { %3741 = vmatprep.subr.mxu0 %v3843_v40 }
 0x713   :  { %3742 = vmatpush3.msra.mxu0 %v2825_v57 }
 0x714   :  { %3743 = vmatprep.subr.mxu0 %v3843_v40 }
 0x715   :  { %3744 = vmatpush3.msra.mxu0 %v2832_v63 }
 0x716   :  { %3745 = vmatprep.subr.mxu0 %v3843_v40 }
 0x717   :  { %3746 = vmatpush3.msra.mxu0 %v2839_v1 }
 0x718   :  { %3748 = vmatmul.mubr.f32.vlgmr.msra.gmra.mxu0 %v2771_v27 }
 0x7b6   :  { %v2878_v32 = vpop.f32.mrf.mxu1 }
 0x7b8   :  { %v3704_v33 = vpop.f32.mrf.mxu1 }
 0x7be   :  { %v2777_v35 = vpop.f32.mrf.mxu0 }
 0x7bf   :  { %v2778_v42 = vadd.f32 %v2777_v35, %v2695_v6 }
 0x7c0   :  { %v3689_v36 = vpop.f32.mrf.mxu0 }
 0x7c1   :  { %v2879_v40 = vadd.f32 %v2878_v32, %v2778_v42 }
 0x7c2   :  { %v3041_v38 = vpop.f32.mrf.mxu1 }
 0x7c4   :  { %v3734_v39 = vpop.f32.mrf.mxu1 }
 0x7cb   :  { %v2962_v41 = vpop.f32.mrf.mxu0 }
 0x7cc   :  { %v2963_v46 = vadd.f32 %v2962_v41, %v2879_v40 }
 0x7cd   :  { %v3719_v43 = vpop.f32.mrf.mxu0 }
 0x7ce   :  { %v3042_v47 = vadd.f32 %v3041_v38, %v2963_v46 }
 0x7d0   :  { %v3207_v44 = vpop.f32.mrf.mxu1 }
 0x7d2   :  { %v3764_v45 = vpop.f32.mrf.mxu1 }
 0x7d8   :  { %v3130_v48 = vpop.f32.mrf.mxu0 }
 0x7d9   :  { %v3131_v49 = vadd.f32 %v3130_v48, %v3042_v47 }
 0x7da   :  { %v3749_v50 = vpop.f32.mrf.mxu0 }
 0x7db   :  { %v3208_v51 = vadd.f32 %v3207_v44, %v3131_v49 }
 0x7dd   :  { %v3212_v52 = vsel %vm3211_vm8, %v3208_v51, -inf }
 0x7de   :  { %3213 = vmax.xlane.f32.xlu1 %v3212_v52 }
 0x867   :  { %v3214_v53 = vpop.xlane.xlu1 %3213 }
 0x868   :  { %v3215_v54 = vsub.f32 %v3208_v51, %v3214_v53 }
 0x86a   :  { %v3216_v55 = vmul.f32 1.442695, %v3215_v54 }
 0x86c   :  { %3786 = vpow2.f32 %v3216_v55 }
 0x879   :  { %v3787_v7 = vpop.eup %3786 }
 0x87a   :  { %v3218_v56 = vsel %vm3211_vm8, %v3787_v7, 0.0 }
 0x87b   :  { %3219 = vadd.xlane.f32.xlu0 %v3218_v56 }
 0x904   :  { %v3220_v57 = vpop.xlane.xlu0 %3219 }
 0x905   :  { %3788 = vlog2.f32 %v3220_v57 }
 0x912   :  { %v3789_v58 = vpop.eup %3788 }
 0x913   :  { %v3222_v59 = vmul.f32 0.6931472, %v3789_v58 }
 0x915   :  { %v3223_v60 = vadd.f32 %v3222_v59, %v3214_v53 }
 0x917   :  { %v3225_v61 = vsub.f32 %v3208_v51, %v3223_v60 }
 0x919   :  { %3226 = vst.msk [vmem:[%s4231_s2] sm:$0x3] %vm3211_vm8, %v3225_v61 }
 0x91a   :  { %3231 = vsyncpa [#allocation3], 1 }
 0x91b   :  { %3232 = vsyncpa [#allocation5], 1 }

</bundles_post_ra>
